<compile_context>
chip_gen: v7x
topology: tpu7x:2x2x1
jax: 0.10.0
libtpu: 0.0.40
codegen_flags: <defaults>
</compile_context>

<pallas_src>
import jax
import jax.numpy as jnp
from jax.experimental import pallas as pl
from jax.experimental.pallas import tpu as pltpu

_LANE = 128          # vreg lane width: feature dims are padded to multiples of this
_BATCH_BLOCK = 128   # rows per grid step for large batches (fills MXU sublanes)


def _round_up(n: int, m: int) -> int:
    return ((n + m - 1) // m) * m


def _mlp_kernel(x_ref,
                w1, w2, w3, w4, w5, w6, w7, w8, w9, w10,
                b_ref, out_ref):
    """One batch tile of the fused MLP.

    x_ref   : (TB, Ip)        bf16  batch tile
    w1..w10 : (in_p, out_p)   bf16  lane-padded, resident across the batch grid
    b_ref   : (10, Pmax)      f32   all biases packed into a single array
    out_ref : (TB, Cp)        f32
    """
    hp = w2.shape[0]      # padded hidden width
    cp = w10.shape[1]     # padded num_classes
    h = x_ref[...]        # already bf16, no astype needed
    for i, w in enumerate((w1, w2, w3, w4, w5, w6, w7, w8, w9)):
        acc = jnp.dot(h, w[...], preferred_element_type=jnp.float32)
        acc = acc + b_ref[i:i + 1, :hp]                  # f32 bias add
        h = jnp.maximum(acc, 0.0).astype(jnp.bfloat16)   # ReLU in f32, bf16 for next dot
    acc = jnp.dot(h, w10[...], preferred_element_type=jnp.float32)
    out_ref[...] = acc + b_ref[9:10, :cp]                # final layer: no ReLU


@jax.jit
def neuralnetwork_forward(x, weights, biases):
    """x: (B, input_size) f32; weights[i]: (in_i, out_i) f32; biases[i]: (1, out_i) f32."""
    batch, input_size = x.shape
    hidden = weights[0].shape[1]
    num_classes = weights[-1].shape[1]
    n_layers = len(weights)

    ip = _round_up(input_size, _LANE)
    hp = _round_up(hidden, _LANE)
    cp = _round_up(num_classes, _LANE)
    pmax = max(hp, cp)

    # 128-row batch blocks for large batches; a single sublane-aligned block for
    # small batches (zero-padding 8 rows up to 128 is pure wasted MXU work).
    tb = _BATCH_BLOCK if batch >= _BATCH_BLOCK else _round_up(batch, 8)
    bp = _round_up(batch, tb)

    # Lane-pad + cast weights to bf16 (MXU inputs stay resident in VMEM).
    padded_w = []
    for li, w in enumerate(weights):
        fan_in_p = ip if li == 0 else hp
        fan_out_p = cp if li == n_layers - 1 else hp
        padded_w.append(jnp.pad(w.astype(jnp.bfloat16),
                                ((0, fan_in_p - w.shape[0]),
                                 (0, fan_out_p - w.shape[1]))))

    # Pack all biases (f32) into one (10, Pmax) array -> single DMA.
    b_pack = jnp.concatenate(
        [jnp.pad(b.reshape(1, -1), ((0, 0), (0, pmax - b.shape[-1]))) for b in biases],
        axis=0).astype(jnp.float32)

    # Pad + cast the input batch once (halves the x DMA bytes).
    x_p = jnp.pad(x.astype(jnp.bfloat16),
                  ((0, bp - batch), (0, ip - input_size)))

    resident = lambda i: (0, 0)   # weights/biases: same block every grid step

    # Explicit VMEM budget: resident weights/biases + double-buffered x/out tiles,
    # with headroom, capped below v7x's 64 MiB per-TensorCore VMEM.
    weight_bytes = sum(w.size * 2 for w in padded_w) + b_pack.size * 4
    io_bytes = 2 * (tb * ip * 2 + tb * cp * 4)
    vmem_limit = int(min(max(4 * (weight_bytes + io_bytes), 32 << 20), 48 << 20))

    y_p = pl.pallas_call(
        _mlp_kernel,
        out_shape=jax.ShapeDtypeStruct((bp, cp), jnp.float32),
        grid_spec=pltpu.PrefetchScalarGridSpec(
            num_scalar_prefetch=0,
            grid=(bp // tb,),
            in_specs=(
                [pl.BlockSpec((tb, ip), lambda i: (i, 0))]
                + [pl.BlockSpec(w.shape, resident) for w in padded_w]
                + [pl.BlockSpec(b_pack.shape, resident)]),
            out_specs=pl.BlockSpec((tb, cp), lambda i: (i, 0)),
        ),
        compiler_params=pltpu.CompilerParams(
            dimension_semantics=("parallel",),   # batch blocks shard across TCs (v7x)
            vmem_limit_bytes=vmem_limit,
        ),
    )(x_p, *padded_w, b_pack)

    return y_p[:batch, :num_classes]


def init_params(key, input_size, hidden_size, num_classes):
    """PyTorch-Linear-style init U(-1/sqrt(fan_in), 1/sqrt(fan_in)).

    Weights stored already transposed to (fan_in, fan_out), biases as (1, fan_out).
    """
    sizes = ([(input_size, hidden_size)]
             + [(hidden_size, hidden_size)] * 8
             + [(hidden_size, num_classes)])
    weights, biases = [], []
    for fan_in, fan_out in sizes:
        key, kw, kb = jax.random.split(key, 3)
        bound = 1.0 / jnp.sqrt(jnp.float32(fan_in))
        weights.append(jax.random.uniform(kw, (fan_in, fan_out), jnp.float32, -bound, bound))
        biases.append(jax.random.uniform(kb, (1, fan_out), jnp.float32, -bound, bound))
    return weights, biases


def reference_forward_f32(x, weights, biases):
    h = x
    for i in range(9):
        h = jnp.maximum(h @ weights[i] + biases[i], 0.0)
    return h @ weights[9] + biases[9]


def reference_forward_bf16(x, weights, biases):
    """Numerics-matched reference: bf16 matmul inputs, f32 accumulation (as the kernel)."""
    h = x.astype(jnp.bfloat16)
    for i in range(9):
        acc = jnp.dot(h, weights[i].astype(jnp.bfloat16),
                      preferred_element_type=jnp.float32) + biases[i]
        h = jnp.maximum(acc, 0.0).astype(jnp.bfloat16)
    return jnp.dot(h, weights[9].astype(jnp.bfloat16),
                   preferred_element_type=jnp.float32) + biases[9]


if __name__ == "__main__":
    input_size, hidden_size, num_classes = 32, 32, 16
    batch = 8

    key = jax.random.PRNGKey(0)
    key, kx = jax.random.split(key)
    x = jax.random.normal(kx, (batch, input_size), jnp.float32)
    weights, biases = init_params(key, input_size, hidden_size, num_classes)

    out = jax.block_until_ready(neuralnetwork_forward(x, weights, biases))
    assert out.shape == (batch, num_classes)

    # Tight check against a reference with identical numerics (bf16 inputs, f32 acc).
    ref_bf16 = reference_forward_bf16(x, weights, biases)
    assert jnp.allclose(out, ref_bf16, atol=1e-2, rtol=1e-2), \
        float(jnp.max(jnp.abs(out - ref_bf16)))

    # Loose sanity check against the pure-f32 PyTorch-equivalent forward.
    ref_f32 = reference_forward_f32(x, weights, biases)
    assert jnp.allclose(out, ref_f32, atol=1e-1, rtol=1e-1), \
        float(jnp.max(jnp.abs(out - ref_f32)))

    print("KERNEL_OK")
</pallas_src>

<mosaic_0001>
module attributes {stable_mosaic.version = 11 : i64} {
  func.func @_mlp_kernel(%arg0: i32, %arg1: memref<8x128xbf16, #tpu.memory_space<vmem>>, %arg2: memref<128x128xbf16, #tpu.memory_space<vmem>>, %arg3: memref<128x128xbf16, #tpu.memory_space<vmem>>, %arg4: memref<128x128xbf16, #tpu.memory_space<vmem>>, %arg5: memref<128x128xbf16, #tpu.memory_space<vmem>>, %arg6: memref<128x128xbf16, #tpu.memory_space<vmem>>, %arg7: memref<128x128xbf16, #tpu.memory_space<vmem>>, %arg8: memref<128x128xbf16, #tpu.memory_space<vmem>>, %arg9: memref<128x128xbf16, #tpu.memory_space<vmem>>, %arg10: memref<128x128xbf16, #tpu.memory_space<vmem>>, %arg11: memref<128x128xbf16, #tpu.memory_space<vmem>>, %arg12: memref<10x128xf32, #tpu.memory_space<vmem>>, %arg13: memref<8x128xf32, #tpu.memory_space<vmem>>) attributes {dimension_semantics = [#tpu.dimension_semantics<parallel>], iteration_bounds = array<i64: 1>, scalar_prefetch = 0 : i64, scratch_operands = 0 : i64, tpu.core_type = #tpu.core_type<tc>, window_params = [{transform_indices = @transform_0, window_bounds = array<i64: 8, 128>}, {pipeline_mode = #tpu.pipeline_mode<synchronous>, transform_indices = @transform_1, window_bounds = array<i64: 128, 128>}, {pipeline_mode = #tpu.pipeline_mode<synchronous>, transform_indices = @transform_2, window_bounds = array<i64: 128, 128>}, {pipeline_mode = #tpu.pipeline_mode<synchronous>, transform_indices = @transform_3, window_bounds = array<i64: 128, 128>}, {pipeline_mode = #tpu.pipeline_mode<synchronous>, transform_indices = @transform_4, window_bounds = array<i64: 128, 128>}, {pipeline_mode = #tpu.pipeline_mode<synchronous>, transform_indices = @transform_5, window_bounds = array<i64: 128, 128>}, {pipeline_mode = #tpu.pipeline_mode<synchronous>, transform_indices = @transform_6, window_bounds = array<i64: 128, 128>}, {pipeline_mode = #tpu.pipeline_mode<synchronous>, transform_indices = @transform_7, window_bounds = array<i64: 128, 128>}, {pipeline_mode = #tpu.pipeline_mode<synchronous>, transform_indices = @transform_8, window_bounds = array<i64: 128, 128>}, {pipeline_mode = #tpu.pipeline_mode<synchronous>, transform_indices = @transform_9, window_bounds = array<i64: 128, 128>}, {pipeline_mode = #tpu.pipeline_mode<synchronous>, transform_indices = @transform_10, window_bounds = array<i64: 128, 128>}, {pipeline_mode = #tpu.pipeline_mode<synchronous>, transform_indices = @transform_11, window_bounds = array<i64: 10, 128>}, {transform_indices = @transform_12, window_bounds = array<i64: 8, 128>}]} {
    %c0 = arith.constant 0 : index
    %c0_0 = arith.constant 0 : index
    %0 = vector.load %arg1[%c0, %c0_0] : memref<8x128xbf16, #tpu.memory_space<vmem>>, vector<8x128xbf16>
    %c0_1 = arith.constant 0 : index
    %c0_2 = arith.constant 0 : index
    %1 = vector.load %arg2[%c0_1, %c0_2] : memref<128x128xbf16, #tpu.memory_space<vmem>>, vector<128x128xbf16>
    %cst = arith.constant dense<0.000000e+00> : vector<8x128xf32>
    %2 = tpu.matmul %0, %1, %cst {dimension_numbers = #tpu.dot_dimension_numbers<[1], [0], [0], [1], [0, 0, 1, 1], [], []>} : vector<8x128xbf16>, vector<128x128xbf16>, vector<8x128xf32> -> vector<8x128xf32>
    %c0_3 = arith.constant 0 : index
    %c0_4 = arith.constant 0 : index
    %3 = vector.load %arg12[%c0_3, %c0_4] : memref<10x128xf32, #tpu.memory_space<vmem>>, vector<1x128xf32>
    %4 = vector.broadcast %3 : vector<1x128xf32> to vector<8x128xf32>
    %5 = arith.addf %2, %4 : vector<8x128xf32>
    %cst_5 = arith.constant 0.000000e+00 : f32
    %6 = vector.broadcast %cst_5 : f32 to vector<8x128xf32>
    %7 = arith.maximumf %5, %6 : vector<8x128xf32>
    %8 = arith.truncf %7 : vector<8x128xf32> to vector<8x128xbf16>
    %c0_6 = arith.constant 0 : index
    %c0_7 = arith.constant 0 : index
    %9 = vector.load %arg3[%c0_6, %c0_7] : memref<128x128xbf16, #tpu.memory_space<vmem>>, vector<128x128xbf16>
    %cst_8 = arith.constant dense<0.000000e+00> : vector<8x128xf32>
    %10 = tpu.matmul %8, %9, %cst_8 {dimension_numbers = #tpu.dot_dimension_numbers<[1], [0], [0], [1], [0, 0, 1, 1], [], []>} : vector<8x128xbf16>, vector<128x128xbf16>, vector<8x128xf32> -> vector<8x128xf32>
    %c1 = arith.constant 1 : index
    %c0_9 = arith.constant 0 : index
    %11 = vector.load %arg12[%c1, %c0_9] : memref<10x128xf32, #tpu.memory_space<vmem>>, vector<1x128xf32>
    %12 = vector.broadcast %11 : vector<1x128xf32> to vector<8x128xf32>
    %13 = arith.addf %10, %12 : vector<8x128xf32>
    %cst_10 = arith.constant 0.000000e+00 : f32
    %14 = vector.broadcast %cst_10 : f32 to vector<8x128xf32>
    %15 = arith.maximumf %13, %14 : vector<8x128xf32>
    %16 = arith.truncf %15 : vector<8x128xf32> to vector<8x128xbf16>
    %c0_11 = arith.constant 0 : index
    %c0_12 = arith.constant 0 : index
    %17 = vector.load %arg4[%c0_11, %c0_12] : memref<128x128xbf16, #tpu.memory_space<vmem>>, vector<128x128xbf16>
    %cst_13 = arith.constant dense<0.000000e+00> : vector<8x128xf32>
    %18 = tpu.matmul %16, %17, %cst_13 {dimension_numbers = #tpu.dot_dimension_numbers<[1], [0], [0], [1], [0, 0, 1, 1], [], []>} : vector<8x128xbf16>, vector<128x128xbf16>, vector<8x128xf32> -> vector<8x128xf32>
    %c2 = arith.constant 2 : index
    %c0_14 = arith.constant 0 : index
    %19 = vector.load %arg12[%c2, %c0_14] : memref<10x128xf32, #tpu.memory_space<vmem>>, vector<1x128xf32>
    %20 = vector.broadcast %19 : vector<1x128xf32> to vector<8x128xf32>
    %21 = arith.addf %18, %20 : vector<8x128xf32>
    %cst_15 = arith.constant 0.000000e+00 : f32
    %22 = vector.broadcast %cst_15 : f32 to vector<8x128xf32>
    %23 = arith.maximumf %21, %22 : vector<8x128xf32>
    %24 = arith.truncf %23 : vector<8x128xf32> to vector<8x128xbf16>
    %c0_16 = arith.constant 0 : index
    %c0_17 = arith.constant 0 : index
    %25 = vector.load %arg5[%c0_16, %c0_17] : memref<128x128xbf16, #tpu.memory_space<vmem>>, vector<128x128xbf16>
    %cst_18 = arith.constant dense<0.000000e+00> : vector<8x128xf32>
    %26 = tpu.matmul %24, %25, %cst_18 {dimension_numbers = #tpu.dot_dimension_numbers<[1], [0], [0], [1], [0, 0, 1, 1], [], []>} : vector<8x128xbf16>, vector<128x128xbf16>, vector<8x128xf32> -> vector<8x128xf32>
    %c3 = arith.constant 3 : index
    %c0_19 = arith.constant 0 : index
    %27 = vector.load %arg12[%c3, %c0_19] : memref<10x128xf32, #tpu.memory_space<vmem>>, vector<1x128xf32>
    %28 = vector.broadcast %27 : vector<1x128xf32> to vector<8x128xf32>
    %29 = arith.addf %26, %28 : vector<8x128xf32>
    %cst_20 = arith.constant 0.000000e+00 : f32
    %30 = vector.broadcast %cst_20 : f32 to vector<8x128xf32>
    %31 = arith.maximumf %29, %30 : vector<8x128xf32>
    %32 = arith.truncf %31 : vector<8x128xf32> to vector<8x128xbf16>
    %c0_21 = arith.constant 0 : index
    %c0_22 = arith.constant 0 : index
    %33 = vector.load %arg6[%c0_21, %c0_22] : memref<128x128xbf16, #tpu.memory_space<vmem>>, vector<128x128xbf16>
    %cst_23 = arith.constant dense<0.000000e+00> : vector<8x128xf32>
    %34 = tpu.matmul %32, %33, %cst_23 {dimension_numbers = #tpu.dot_dimension_numbers<[1], [0], [0], [1], [0, 0, 1, 1], [], []>} : vector<8x128xbf16>, vector<128x128xbf16>, vector<8x128xf32> -> vector<8x128xf32>
    %c4 = arith.constant 4 : index
    %c0_24 = arith.constant 0 : index
    %35 = vector.load %arg12[%c4, %c0_24] : memref<10x128xf32, #tpu.memory_space<vmem>>, vector<1x128xf32>
    %36 = vector.broadcast %35 : vector<1x128xf32> to vector<8x128xf32>
    %37 = arith.addf %34, %36 : vector<8x128xf32>
    %cst_25 = arith.constant 0.000000e+00 : f32
    %38 = vector.broadcast %cst_25 : f32 to vector<8x128xf32>
    %39 = arith.maximumf %37, %38 : vector<8x128xf32>
    %40 = arith.truncf %39 : vector<8x128xf32> to vector<8x128xbf16>
    %c0_26 = arith.constant 0 : index
    %c0_27 = arith.constant 0 : index
    %41 = vector.load %arg7[%c0_26, %c0_27] : memref<128x128xbf16, #tpu.memory_space<vmem>>, vector<128x128xbf16>
    %cst_28 = arith.constant dense<0.000000e+00> : vector<8x128xf32>
    %42 = tpu.matmul %40, %41, %cst_28 {dimension_numbers = #tpu.dot_dimension_numbers<[1], [0], [0], [1], [0, 0, 1, 1], [], []>} : vector<8x128xbf16>, vector<128x128xbf16>, vector<8x128xf32> -> vector<8x128xf32>
    %c5 = arith.constant 5 : index
    %c0_29 = arith.constant 0 : index
    %43 = vector.load %arg12[%c5, %c0_29] : memref<10x128xf32, #tpu.memory_space<vmem>>, vector<1x128xf32>
    %44 = vector.broadcast %43 : vector<1x128xf32> to vector<8x128xf32>
    %45 = arith.addf %42, %44 : vector<8x128xf32>
    %cst_30 = arith.constant 0.000000e+00 : f32
    %46 = vector.broadcast %cst_30 : f32 to vector<8x128xf32>
    %47 = arith.maximumf %45, %46 : vector<8x128xf32>
    %48 = arith.truncf %47 : vector<8x128xf32> to vector<8x128xbf16>
    %c0_31 = arith.constant 0 : index
    %c0_32 = arith.constant 0 : index
    %49 = vector.load %arg8[%c0_31, %c0_32] : memref<128x128xbf16, #tpu.memory_space<vmem>>, vector<128x128xbf16>
    %cst_33 = arith.constant dense<0.000000e+00> : vector<8x128xf32>
    %50 = tpu.matmul %48, %49, %cst_33 {dimension_numbers = #tpu.dot_dimension_numbers<[1], [0], [0], [1], [0, 0, 1, 1], [], []>} : vector<8x128xbf16>, vector<128x128xbf16>, vector<8x128xf32> -> vector<8x128xf32>
    %c6 = arith.constant 6 : index
    %c0_34 = arith.constant 0 : index
    %51 = vector.load %arg12[%c6, %c0_34] : memref<10x128xf32, #tpu.memory_space<vmem>>, vector<1x128xf32>
    %52 = vector.broadcast %51 : vector<1x128xf32> to vector<8x128xf32>
    %53 = arith.addf %50, %52 : vector<8x128xf32>
    %cst_35 = arith.constant 0.000000e+00 : f32
    %54 = vector.broadcast %cst_35 : f32 to vector<8x128xf32>
    %55 = arith.maximumf %53, %54 : vector<8x128xf32>
    %56 = arith.truncf %55 : vector<8x128xf32> to vector<8x128xbf16>
    %c0_36 = arith.constant 0 : index
    %c0_37 = arith.constant 0 : index
    %57 = vector.load %arg9[%c0_36, %c0_37] : memref<128x128xbf16, #tpu.memory_space<vmem>>, vector<128x128xbf16>
    %cst_38 = arith.constant dense<0.000000e+00> : vector<8x128xf32>
    %58 = tpu.matmul %56, %57, %cst_38 {dimension_numbers = #tpu.dot_dimension_numbers<[1], [0], [0], [1], [0, 0, 1, 1], [], []>} : vector<8x128xbf16>, vector<128x128xbf16>, vector<8x128xf32> -> vector<8x128xf32>
    %c7 = arith.constant 7 : index
    %c0_39 = arith.constant 0 : index
    %59 = vector.load %arg12[%c7, %c0_39] : memref<10x128xf32, #tpu.memory_space<vmem>>, vector<1x128xf32>
    %60 = vector.broadcast %59 : vector<1x128xf32> to vector<8x128xf32>
    %61 = arith.addf %58, %60 : vector<8x128xf32>
    %cst_40 = arith.constant 0.000000e+00 : f32
    %62 = vector.broadcast %cst_40 : f32 to vector<8x128xf32>
    %63 = arith.maximumf %61, %62 : vector<8x128xf32>
    %64 = arith.truncf %63 : vector<8x128xf32> to vector<8x128xbf16>
    %c0_41 = arith.constant 0 : index
    %c0_42 = arith.constant 0 : index
    %65 = vector.load %arg10[%c0_41, %c0_42] : memref<128x128xbf16, #tpu.memory_space<vmem>>, vector<128x128xbf16>
    %cst_43 = arith.constant dense<0.000000e+00> : vector<8x128xf32>
    %66 = tpu.matmul %64, %65, %cst_43 {dimension_numbers = #tpu.dot_dimension_numbers<[1], [0], [0], [1], [0, 0, 1, 1], [], []>} : vector<8x128xbf16>, vector<128x128xbf16>, vector<8x128xf32> -> vector<8x128xf32>
    %c8 = arith.constant 8 : index
    %c0_44 = arith.constant 0 : index
    %67 = vector.load %arg12[%c8, %c0_44] : memref<10x128xf32, #tpu.memory_space<vmem>>, vector<1x128xf32>
    %68 = vector.broadcast %67 : vector<1x128xf32> to vector<8x128xf32>
    %69 = arith.addf %66, %68 : vector<8x128xf32>
    %cst_45 = arith.constant 0.000000e+00 : f32
    %70 = vector.broadcast %cst_45 : f32 to vector<8x128xf32>
    %71 = arith.maximumf %69, %70 : vector<8x128xf32>
    %72 = arith.truncf %71 : vector<8x128xf32> to vector<8x128xbf16>
    %c0_46 = arith.constant 0 : index
    %c0_47 = arith.constant 0 : index
    %73 = vector.load %arg11[%c0_46, %c0_47] : memref<128x128xbf16, #tpu.memory_space<vmem>>, vector<128x128xbf16>
    %cst_48 = arith.constant dense<0.000000e+00> : vector<8x128xf32>
    %74 = tpu.matmul %72, %73, %cst_48 {dimension_numbers = #tpu.dot_dimension_numbers<[1], [0], [0], [1], [0, 0, 1, 1], [], []>} : vector<8x128xbf16>, vector<128x128xbf16>, vector<8x128xf32> -> vector<8x128xf32>
    %c9 = arith.constant 9 : index
    %c0_49 = arith.constant 0 : index
    %75 = vector.load %arg12[%c9, %c0_49] : memref<10x128xf32, #tpu.memory_space<vmem>>, vector<1x128xf32>
    %76 = vector.broadcast %75 : vector<1x128xf32> to vector<8x128xf32>
    %77 = arith.addf %74, %76 : vector<8x128xf32>
    %c0_50 = arith.constant 0 : index
    %c0_51 = arith.constant 0 : index
    %78 = vector.load %arg13[%c0_50, %c0_51] : memref<8x128xf32, #tpu.memory_space<vmem>>, vector<8x128xf32>
    tpu.vector_store %arg13[%c0_50, %c0_51], %77 {strides = array<i32>} : memref<8x128xf32, #tpu.memory_space<vmem>>, vector<8x128xf32>,
    return
  }
  func.func @transform_0(%arg0: i32) -> (i32, i32) {
    %c0_i32 = arith.constant 0 : i32
    %c0_i32_0 = arith.constant 0 : i32
    return %arg0, %c0_i32 : i32, i32
  }
  func.func @transform_1(%arg0: i32) -> (i32, i32) {
    %c0_i32 = arith.constant 0 : i32
    %c0_i32_0 = arith.constant 0 : i32
    %c0_i32_1 = arith.constant 0 : i32
    return %c0_i32, %c0_i32_0 : i32, i32
  }
  func.func @transform_2(%arg0: i32) -> (i32, i32) {
    %c0_i32 = arith.constant 0 : i32
    %c0_i32_0 = arith.constant 0 : i32
    %c0_i32_1 = arith.constant 0 : i32
    return %c0_i32, %c0_i32_0 : i32, i32
  }
  func.func @transform_3(%arg0: i32) -> (i32, i32) {
    %c0_i32 = arith.constant 0 : i32
    %c0_i32_0 = arith.constant 0 : i32
    %c0_i32_1 = arith.constant 0 : i32
    return %c0_i32, %c0_i32_0 : i32, i32
  }
  func.func @transform_4(%arg0: i32) -> (i32, i32) {
    %c0_i32 = arith.constant 0 : i32
    %c0_i32_0 = arith.constant 0 : i32
    %c0_i32_1 = arith.constant 0 : i32
    return %c0_i32, %c0_i32_0 : i32, i32
  }
  func.func @transform_5(%arg0: i32) -> (i32, i32) {
    %c0_i32 = arith.constant 0 : i32
    %c0_i32_0 = arith.constant 0 : i32
    %c0_i32_1 = arith.constant 0 : i32
    return %c0_i32, %c0_i32_0 : i32, i32
  }
  func.func @transform_6(%arg0: i32) -> (i32, i32) {
    %c0_i32 = arith.constant 0 : i32
    %c0_i32_0 = arith.constant 0 : i32
    %c0_i32_1 = arith.constant 0 : i32
    return %c0_i32, %c0_i32_0 : i32, i32
  }
  func.func @transform_7(%arg0: i32) -> (i32, i32) {
    %c0_i32 = arith.constant 0 : i32
    %c0_i32_0 = arith.constant 0 : i32
    %c0_i32_1 = arith.constant 0 : i32
    return %c0_i32, %c0_i32_0 : i32, i32
  }
  func.func @transform_8(%arg0: i32) -> (i32, i32) {
    %c0_i32 = arith.constant 0 : i32
    %c0_i32_0 = arith.constant 0 : i32
    %c0_i32_1 = arith.constant 0 : i32
    return %c0_i32, %c0_i32_0 : i32, i32
  }
  func.func @transform_9(%arg0: i32) -> (i32, i32) {
    %c0_i32 = arith.constant 0 : i32
    %c0_i32_0 = arith.constant 0 : i32
    %c0_i32_1 = arith.constant 0 : i32
    return %c0_i32, %c0_i32_0 : i32, i32
  }
  func.func @transform_10(%arg0: i32) -> (i32, i32) {
    %c0_i32 = arith.constant 0 : i32
    %c0_i32_0 = arith.constant 0 : i32
    %c0_i32_1 = arith.constant 0 : i32
    return %c0_i32, %c0_i32_0 : i32, i32
  }
  func.func @transform_11(%arg0: i32) -> (i32, i32) {
    %c0_i32 = arith.constant 0 : i32
    %c0_i32_0 = arith.constant 0 : i32
    %c0_i32_1 = arith.constant 0 : i32
    return %c0_i32, %c0_i32_0 : i32, i32
  }
  func.func @transform_12(%arg0: i32) -> (i32, i32) {
    %c0_i32 = arith.constant 0 : i32
    %c0_i32_0 = arith.constant 0 : i32
    return %arg0, %c0_i32 : i32, i32
  }
}

</mosaic_0001>

<bundles_post_ra>
// kernel: neuralnetwork_forward.1
= control target key start
LH: loop header
LB: loop body
LE: loop exit
PB: predicated region body
PF: predicated region fallthrough
CT: control target
= control target key end

     0   :  { %v1654_v1 = vmov 0.0   ;;  %vm1655_vm0 = vmmov 0   ;;  %s2107_s0 = inlined_call_operand.vmem [shape: bf16[8,128], index: 0, kind: input, shape index: {}]   ;;  %s2108_s1 = inlined_call_operand.vmem [shape: bf16[128,128], index: 1, kind: input, shape index: {}]   ;;  %s2109_s2 = inlined_call_operand.vmem [shape: bf16[128,128], index: 2, kind: input, shape index: {}]   ;;  %s2110_s3 = inlined_call_operand.vmem [shape: bf16[128,128], index: 3, kind: input, shape index: {}]   ;;  %s2111_s4 = inlined_call_operand.vmem [shape: bf16[128,128], index: 4, kind: input, shape index: {}]   ;;  %s2112_s5 = inlined_call_operand.vmem [shape: bf16[128,128], index: 5, kind: input, shape index: {}]   ;;  %s2113_s6 = inlined_call_operand.vmem [shape: bf16[128,128], index: 6, kind: input, shape index: {}]   ;;  %s2114_s7 = inlined_call_operand.vmem [shape: bf16[128,128], index: 7, kind: input, shape index: {}]   ;;  %s2115_s8 = inlined_call_operand.vmem [shape: bf16[128,128], index: 8, kind: input, shape index: {}]   ;;  %s2116_s9 = inlined_call_operand.vmem [shape: bf16[128,128], index: 9, kind: input, shape index: {}]   ;;  %s2117_s10 = inlined_call_operand.vmem [shape: bf16[128,128], index: 10, kind: input, shape index: {}]   ;;  %s2118_s11 = inlined_call_operand.vmem [shape: f32[10,128], index: 11, kind: input, shape index: {}]   ;;  %s2119_s12 = inlined_call_operand.hbm [shape: f32[8,128], index: 12, kind: output, shape index: {}]  }
   0x1   :  { %v1550_v0 = vld [vmem:[%s2108_s1] sm:$0xff]   ;;  %1347 = vmatprep.subr.bf16.mxu0 %v1654_v1  ;;  %1367 = vmatprep.subr.bf16.mxu1 %v1654_v1  ;;  %v1551_v2 = vld [vmem:[%s2108_s1 + $0x8] sm:$0xff]   ;;  %v1552_v3 = vld [vmem:[%s2108_s1 + $0x10] sm:$0xff]  }
   0x2   :  { %1348 = vmatpush3.bf16.msra.mxu0 %v1550_v0  ;;  %1363 = vmatprep.mubr.msk.bf16.mxu0 %vm1655_vm0, %v1654_v1  ;;  %v1558_v4 = vld [vmem:[%s2109_s2] sm:$0xff]   ;;  %v1553_v5 = vld [vmem:[%s2108_s1 + $0x18] sm:$0xff]   ;;  %v1559_v6 = vld [vmem:[%s2109_s2 + $0x8] sm:$0xff]  }
   0x3   :  { %1349 = vmatprep.subr.bf16.mxu0 %v1654_v1  ;;  %1383 = vmatprep.mubr.msk.bf16.mxu1 %vm1655_vm0, %v1654_v1  ;;  %v1554_v7 = vld [vmem:[%s2108_s1 + $0x20] sm:$0xff]   ;;  %v1560_v8 = vld [vmem:[%s2109_s2 + $0x10] sm:$0xff]   ;;  %v1555_v9 = vld [vmem:[%s2108_s1 + $0x28] sm:$0xff]  }
   0x4   :  { %1368 = vmatpush3.bf16.msra.mxu1 %v1558_v4  ;;  %v1561_v10 = vld [vmem:[%s2109_s2 + $0x18] sm:$0xff]   ;;  %v1556_v11 = vld [vmem:[%s2108_s1 + $0x30] sm:$0xff]   ;;  %v1562_v12 = vld [vmem:[%s2109_s2 + $0x20] sm:$0xff]  }
   0x5   :  { %1369 = vmatprep.subr.bf16.mxu1 %v1654_v1  ;;  %v1557_v13 = vld [vmem:[%s2108_s1 + $0x38] sm:$0xff]   ;;  %v1563_v14 = vld [vmem:[%s2109_s2 + $0x28] sm:$0xff]   ;;  %v43_v15 = vld [vmem:[%s2107_s0] sm:$0xf] }
   0x6   :  { %1350 = vmatpush3.bf16.msra.mxu0 %v1551_v2 }
   0x7   :  { %1351 = vmatprep.subr.bf16.mxu0 %v1654_v1 }
   0x8   :  { %1370 = vmatpush3.bf16.msra.mxu1 %v1559_v6 }
   0x9   :  { %1371 = vmatprep.subr.bf16.mxu1 %v1654_v1 }
   0xa   :  { %1352 = vmatpush3.bf16.msra.mxu0 %v1552_v3 }
   0xb   :  { %1353 = vmatprep.subr.bf16.mxu0 %v1654_v1 }
   0xc   :  { %1372 = vmatpush3.bf16.msra.mxu1 %v1560_v8 }
   0xd   :  { %1373 = vmatprep.subr.bf16.mxu1 %v1654_v1 }
   0xe   :  { %1354 = vmatpush3.bf16.msra.mxu0 %v1553_v5 }
   0xf   :  { %1355 = vmatprep.subr.bf16.mxu0 %v1654_v1 }
  0x10   :  { %1374 = vmatpush3.bf16.msra.mxu1 %v1561_v10 }
  0x11   :  { %1375 = vmatprep.subr.bf16.mxu1 %v1654_v1 }
  0x12   :  { %1356 = vmatpush3.bf16.msra.mxu0 %v1554_v7 }
  0x13   :  { %1357 = vmatprep.subr.bf16.mxu0 %v1654_v1 }
  0x14   :  { %1376 = vmatpush3.bf16.msra.mxu1 %v1562_v12 }
  0x15   :  { %1377 = vmatprep.subr.bf16.mxu1 %v1654_v1 }
  0x16   :  { %1358 = vmatpush3.bf16.msra.mxu0 %v1555_v9 }
  0x17   :  { %1359 = vmatprep.subr.bf16.mxu0 %v1654_v1 }
  0x18   :  { %1378 = vmatpush3.bf16.msra.mxu1 %v1563_v14 }
  0x19   :  { %1379 = vmatprep.subr.bf16.mxu1 %v1654_v1 }
  0x1a   :  { %1360 = vmatpush3.bf16.msra.mxu0 %v1556_v11 }
  0x1b   :  { %1361 = vmatprep.subr.bf16.mxu0 %v1654_v1 }
  0x1e   :  { %1362 = vmatpush3.bf16.msra.mxu0 %v1557_v13 }
  0x1f   :  { %1387 = vmatprep.subr.bf16.mxu0 %v1654_v1 }
  0x21   :  { %1364 = vmatmul.mubr.bf16.vlgmr.msra.gmra.mrb[0].mxu0 %v43_v15 }
  0x22   :  { %1403 = vmatprep.mubr.msk.bf16.mxu0 %vm1655_vm0, %v1654_v1 }
  0x23   :  { %17 = vsyncpa [#allocation3], 0  ;;  %v1564_v16 = vld [vmem:[%s2109_s2 + $0x30] sm:$0xff]   ;;  %v1565_v17 = vld [vmem:[%s2109_s2 + $0x38] sm:$0xff]   ;;  %s1656_s17 = smov [#allocation2]  }
  0x24   :  { %1380 = vmatpush3.bf16.msra.mxu1 %v1564_v16  ;;  %v1566_v18 = vld [vmem:[%s2110_s3] sm:$0xff]   ;;  %v1567_v19 = vld [vmem:[%s2110_s3 + $0x8] sm:$0xff]   ;;  %v1568_v20 = vld [vmem:[%s2110_s3 + $0x10] sm:$0xff]   ;;  %s1159_s18 = sshll.u32 %s1656_s17, 4  ;;  %s1160_s18 = int_to_ptr.vmem [resolvable:$true] %s1159_s18 }
  0x25   :  { %1381 = vmatprep.subr.bf16.mxu1 %v1654_v1  ;;  %1388 = vmatpush3.bf16.msra.mxu0 %v1566_v18  ;;  %v1569_v21 = vld [vmem:[%s2110_s3 + $0x18] sm:$0xff]   ;;  %v1570_v22 = vld [vmem:[%s2110_s3 + $0x20] sm:$0xff]   ;;  %v1571_v23 = vld [vmem:[%s2110_s3 + $0x28] sm:$0xff]   ;;  %p1635_p1 = scmp.lt.s32.totalorder %s1160_s18, %s1160_s18 }
  0x26   :  { %1389 = vmatprep.subr.bf16.mxu0 %v1654_v1  ;;  %v1167_v24 = vld [vmem:[%s2118_s11] ss:$0 sm:$0xff]  ;;  %v1572_v32 = vld [vmem:[%s2110_s3 + $0x30] sm:$0xff]   ;;  %v1573_v33 = vld [vmem:[%s2110_s3 + $0x38] sm:$0xff]  }
  0x27   :  { %v1574_v34 = vld [vmem:[%s2111_s4] sm:$0xff]   ;;  %v1575_v35 = vld [vmem:[%s2111_s4 + $0x8] sm:$0xff]   ;;  %v1576_v36 = vld [vmem:[%s2111_s4 + $0x10] sm:$0xff]  }
  0x28   :  { %1382 = vmatpush3.bf16.msra.mxu1 %v1565_v17  ;;  %v1577_v37 = vld [vmem:[%s2111_s4 + $0x18] sm:$0xff]   ;;  %v1578_v38 = vld [vmem:[%s2111_s4 + $0x20] sm:$0xff]   ;;  %v1579_v39 = vld [vmem:[%s2111_s4 + $0x28] sm:$0xff]  }
  0x29   :  { %1407 = vmatprep.subr.bf16.mxu1 %v1654_v1  ;;  %1390 = vmatpush3.bf16.msra.mxu0 %v1567_v19  ;;  %v1176_v40 = vld [vmem:[%s2118_s11 + $0x1] ss:$0 sm:$0xff]  ;;  %v1580_v48 = vld [vmem:[%s2111_s4 + $0x30] sm:$0xff]   ;;  %v1581_v49 = vld [vmem:[%s2111_s4 + $0x38] sm:$0xff]  }
  0x2a   :  { %1391 = vmatprep.subr.bf16.mxu0 %v1654_v1  ;;  %v1582_v50 = vld [vmem:[%s2112_s5] sm:$0xff]   ;;  %v1583_v51 = vld [vmem:[%s2112_s5 + $0x8] sm:$0xff]   ;;  %v1584_v52 = vld [vmem:[%s2112_s5 + $0x10] sm:$0xff]  }
  0x2b   :  { %v1585_v53 = vld [vmem:[%s2112_s5 + $0x18] sm:$0xff]   ;;  %v1586_v54 = vld [vmem:[%s2112_s5 + $0x20] sm:$0xff]   ;;  %v1587_v55 = vld [vmem:[%s2112_s5 + $0x28] sm:$0xff]  }
  0x2c   :  { %v1185_v56 = vld [vmem:[%s2118_s11 + $0x2] ss:$0 sm:$0xff]  ;;  %v1588_v0 = vld [vmem:[%s2112_s5 + $0x30] sm:$0xff]   ;;  %v1589_v2 = vld [vmem:[%s2112_s5 + $0x38] sm:$0xff]  }
  0x2d   :  { %1392 = vmatpush3.bf16.msra.mxu0 %v1568_v20  ;;  %v1590_v3 = vld [vmem:[%s2113_s6] sm:$0xff]   ;;  %v1591_v4 = vld [vmem:[%s2113_s6 + $0x8] sm:$0xff]   ;;  %v1592_v5 = vld [vmem:[%s2113_s6 + $0x10] sm:$0xff]  }
  0x2e   :  { %1393 = vmatprep.subr.bf16.mxu0 %v1654_v1  ;;  %v1593_v6 = vld [vmem:[%s2113_s6 + $0x18] sm:$0xff]   ;;  %v1594_v7 = vld [vmem:[%s2113_s6 + $0x20] sm:$0xff]   ;;  %v1595_v8 = vld [vmem:[%s2113_s6 + $0x28] sm:$0xff]  }
  0x2f   :  { %v1194_v9 = vld [vmem:[%s2118_s11 + $0x3] ss:$0 sm:$0xff]  ;;  %v1596_v17 = vld [vmem:[%s2113_s6 + $0x30] sm:$0xff]   ;;  %v1597_v18 = vld [vmem:[%s2113_s6 + $0x38] sm:$0xff]  }
  0x30   :  { %v1598_v19 = vld [vmem:[%s2114_s7] sm:$0xff]   ;;  %v1599_v20 = vld [vmem:[%s2114_s7 + $0x8] sm:$0xff]  }
  0x31   :  { %1394 = vmatpush3.bf16.msra.mxu0 %v1569_v21  ;;  %v1600_v21 = vld [vmem:[%s2114_s7 + $0x10] sm:$0xff]  }
  0x32   :  { %1395 = vmatprep.subr.bf16.mxu0 %v1654_v1 }
  0x35   :  { %1396 = vmatpush3.bf16.msra.mxu0 %v1570_v22  ;;  %v1601_v22 = vld [vmem:[%s2114_s7 + $0x18] sm:$0xff]  }
  0x36   :  { %1397 = vmatprep.subr.bf16.mxu0 %v1654_v1 }
  0x39   :  { %1398 = vmatpush3.bf16.msra.mxu0 %v1571_v23  ;;  %v1602_v23 = vld [vmem:[%s2114_s7 + $0x20] sm:$0xff]  }
  0x3a   :  { %1399 = vmatprep.subr.bf16.mxu0 %v1654_v1 }
  0x3d   :  { %1400 = vmatpush3.bf16.msra.mxu0 %v1572_v32 }
  0x3e   :  { %1401 = vmatprep.subr.bf16.mxu0 %v1654_v1 }
  0x41   :  { %1402 = vmatpush3.bf16.msra.mxu0 %v1573_v33  ;;  %v1604_v33 = vld [vmem:[%s2114_s7 + $0x30] sm:$0xff]  }
  0x42   :  { %1427 = vmatprep.subr.bf16.mxu0 %v1654_v1 }
  0xf4   :  { %v147_v25 = vpop.f32.mrb[0].mxu0 }
  0xf5   :  { %v148_v26 = vadd.f32 %v1167_v24, %v147_v25  ;;  %v1365_v27 = vpop.f32.mrb[1].mxu0  ;;  %v1603_v24 = vld [vmem:[%s2114_s7 + $0x28] sm:$0xff]   ;;  %v1203_v25 = vld [vmem:[%s2118_s11 + $0x4] ss:$0 sm:$0xff] }
  0xf6   :  { %v150_v28 = vpop.f32.mrb[2].mxu0 }
  0xf7   :  { %v153_v29 = vmax.f32 %v148_v26, 0.0  ;;  %v1366_v30 = vpop.f32.mrb[3].mxu0 }
  0xf9   :  { %v154_v31 = vpack.c.bf16 %v153_v29, %v153_v29 }
  0xfb   :  { %1384 = vmatmul.mubr.bf16.vlgmr.msra.gmra.mrb[0].mxu1 %v154_v31 }
  0xfc   :  { %1423 = vmatprep.mubr.msk.bf16.mxu1 %vm1655_vm0, %v1654_v1  ;;  %1408 = vmatpush3.bf16.msra.mxu1 %v1574_v34  ;;  %v1605_v34 = vld [vmem:[%s2114_s7 + $0x38] sm:$0xff]  }
  0xfd   :  { %1409 = vmatprep.subr.bf16.mxu1 %v1654_v1 }
 0x100   :  { %1410 = vmatpush3.bf16.msra.mxu1 %v1575_v35  ;;  %v1606_v35 = vld [vmem:[%s2115_s8] sm:$0xff]  }
 0x101   :  { %1411 = vmatprep.subr.bf16.mxu1 %v1654_v1 }
 0x104   :  { %1412 = vmatpush3.bf16.msra.mxu1 %v1576_v36  ;;  %v1607_v36 = vld [vmem:[%s2115_s8 + $0x8] sm:$0xff]  }
 0x105   :  { %1413 = vmatprep.subr.bf16.mxu1 %v1654_v1 }
 0x108   :  { %1414 = vmatpush3.bf16.msra.mxu1 %v1577_v37  ;;  %v1608_v37 = vld [vmem:[%s2115_s8 + $0x10] sm:$0xff]  }
 0x109   :  { %1415 = vmatprep.subr.bf16.mxu1 %v1654_v1 }
 0x10c   :  { %1416 = vmatpush3.bf16.msra.mxu1 %v1578_v38  ;;  %v1609_v38 = vld [vmem:[%s2115_s8 + $0x18] sm:$0xff]  }
 0x10d   :  { %1417 = vmatprep.subr.bf16.mxu1 %v1654_v1 }
 0x110   :  { %1418 = vmatpush3.bf16.msra.mxu1 %v1579_v39  ;;  %v1610_v39 = vld [vmem:[%s2115_s8 + $0x20] sm:$0xff]  }
 0x111   :  { %1419 = vmatprep.subr.bf16.mxu1 %v1654_v1 }
 0x114   :  { %1420 = vmatpush3.bf16.msra.mxu1 %v1580_v48 }
 0x115   :  { %1421 = vmatprep.subr.bf16.mxu1 %v1654_v1 }
 0x118   :  { %1422 = vmatpush3.bf16.msra.mxu1 %v1581_v49  ;;  %v1612_v49 = vld [vmem:[%s2115_s8 + $0x30] sm:$0xff]  }
 0x119   :  { %1447 = vmatprep.subr.bf16.mxu1 %v1654_v1 }
 0x1ce   :  { %v258_v41 = vpop.f32.mrb[0].mxu1 }
 0x1cf   :  { %v259_v42 = vadd.f32 %v1176_v40, %v258_v41  ;;  %v1385_v43 = vpop.f32.mrb[1].mxu1  ;;  %v1611_v40 = vld [vmem:[%s2115_s8 + $0x28] sm:$0xff]   ;;  %v1212_v41 = vld [vmem:[%s2118_s11 + $0x5] ss:$0 sm:$0xff] }
 0x1d0   :  { %v261_v44 = vpop.f32.mrb[2].mxu1 }
 0x1d1   :  { %v264_v45 = vmax.f32 %v259_v42, 0.0  ;;  %v1386_v46 = vpop.f32.mrb[3].mxu1 }
 0x1d3   :  { %v265_v47 = vpack.c.bf16 %v264_v45, %v264_v45 }
 0x1d5   :  { %1404 = vmatmul.mubr.bf16.vlgmr.msra.gmra.mrb[4].mxu0 %v265_v47 }
 0x1d6   :  { %1443 = vmatprep.mubr.msk.bf16.mxu0 %vm1655_vm0, %v1654_v1  ;;  %1428 = vmatpush3.bf16.msra.mxu0 %v1582_v50  ;;  %v1613_v50 = vld [vmem:[%s2115_s8 + $0x38] sm:$0xff]  }
 0x1d7   :  { %1429 = vmatprep.subr.bf16.mxu0 %v1654_v1 }
 0x1da   :  { %1430 = vmatpush3.bf16.msra.mxu0 %v1583_v51  ;;  %v1614_v51 = vld [vmem:[%s2116_s9] sm:$0xff]  }
 0x1db   :  { %1431 = vmatprep.subr.bf16.mxu0 %v1654_v1 }
 0x1de   :  { %1432 = vmatpush3.bf16.msra.mxu0 %v1584_v52  ;;  %v1615_v52 = vld [vmem:[%s2116_s9 + $0x8] sm:$0xff]  }
 0x1df   :  { %1433 = vmatprep.subr.bf16.mxu0 %v1654_v1 }
 0x1e2   :  { %1434 = vmatpush3.bf16.msra.mxu0 %v1585_v53  ;;  %v1616_v53 = vld [vmem:[%s2116_s9 + $0x10] sm:$0xff]  }
 0x1e3   :  { %1435 = vmatprep.subr.bf16.mxu0 %v1654_v1 }
 0x1e6   :  { %1436 = vmatpush3.bf16.msra.mxu0 %v1586_v54  ;;  %v1617_v54 = vld [vmem:[%s2116_s9 + $0x18] sm:$0xff]  }
 0x1e7   :  { %1437 = vmatprep.subr.bf16.mxu0 %v1654_v1 }
 0x1ea   :  { %1438 = vmatpush3.bf16.msra.mxu0 %v1587_v55  ;;  %v1618_v55 = vld [vmem:[%s2116_s9 + $0x20] sm:$0xff]  }
 0x1eb   :  { %1439 = vmatprep.subr.bf16.mxu0 %v1654_v1 }
 0x1ee   :  { %1440 = vmatpush3.bf16.msra.mxu0 %v1588_v0 }
 0x1ef   :  { %1441 = vmatprep.subr.bf16.mxu0 %v1654_v1 }
 0x1f2   :  { %1442 = vmatpush3.bf16.msra.mxu0 %v1589_v2  ;;  %v1620_v2 = vld [vmem:[%s2116_s9 + $0x30] sm:$0xff]  }
 0x1f3   :  { %1467 = vmatprep.subr.bf16.mxu0 %v1654_v1 }
 0x2a8   :  { %v369_v57 = vpop.f32.mrb[4].mxu0 }
 0x2a9   :  { %v370_v58 = vadd.f32 %v1185_v56, %v369_v57  ;;  %v1405_v59 = vpop.f32.mrb[5].mxu0  ;;  %v1619_v56 = vld [vmem:[%s2116_s9 + $0x28] sm:$0xff]   ;;  %v1221_v57 = vld [vmem:[%s2118_s11 + $0x6] ss:$0 sm:$0xff] }
 0x2aa   :  { %v372_v60 = vpop.f32.mrb[6].mxu0 }
 0x2ab   :  { %v375_v61 = vmax.f32 %v370_v58, 0.0  ;;  %v1406_v62 = vpop.f32.mrb[7].mxu0 }
 0x2ad   :  { %v376_v63 = vpack.c.bf16 %v375_v61, %v375_v61 }
 0x2af   :  { %1424 = vmatmul.mubr.bf16.vlgmr.msra.gmra.mrb[4].mxu1 %v376_v63 }
 0x2b0   :  { %1463 = vmatprep.mubr.msk.bf16.mxu1 %vm1655_vm0, %v1654_v1  ;;  %1448 = vmatpush3.bf16.msra.mxu1 %v1590_v3  ;;  %v1621_v3 = vld [vmem:[%s2116_s9 + $0x38] sm:$0xff]  }
 0x2b1   :  { %1449 = vmatprep.subr.bf16.mxu1 %v1654_v1 }
 0x2b4   :  { %1450 = vmatpush3.bf16.msra.mxu1 %v1591_v4  ;;  %v1622_v4 = vld [vmem:[%s2117_s10] sm:$0xff]  }
 0x2b5   :  { %1451 = vmatprep.subr.bf16.mxu1 %v1654_v1 }
 0x2b8   :  { %1452 = vmatpush3.bf16.msra.mxu1 %v1592_v5  ;;  %v1623_v5 = vld [vmem:[%s2117_s10 + $0x8] sm:$0xff]  }
 0x2b9   :  { %1453 = vmatprep.subr.bf16.mxu1 %v1654_v1 }
 0x2bc   :  { %1454 = vmatpush3.bf16.msra.mxu1 %v1593_v6  ;;  %v1624_v6 = vld [vmem:[%s2117_s10 + $0x10] sm:$0xff]  }
 0x2bd   :  { %1455 = vmatprep.subr.bf16.mxu1 %v1654_v1 }
 0x2c0   :  { %1456 = vmatpush3.bf16.msra.mxu1 %v1594_v7  ;;  %v1625_v7 = vld [vmem:[%s2117_s10 + $0x18] sm:$0xff]  }
 0x2c1   :  { %1457 = vmatprep.subr.bf16.mxu1 %v1654_v1 }
 0x2c4   :  { %1458 = vmatpush3.bf16.msra.mxu1 %v1595_v8  ;;  %v1626_v8 = vld [vmem:[%s2117_s10 + $0x20] sm:$0xff]  }
 0x2c5   :  { %1459 = vmatprep.subr.bf16.mxu1 %v1654_v1 }
 0x2c8   :  { %1460 = vmatpush3.bf16.msra.mxu1 %v1596_v17 }
 0x2c9   :  { %1461 = vmatprep.subr.bf16.mxu1 %v1654_v1 }
 0x2cc   :  { %1462 = vmatpush3.bf16.msra.mxu1 %v1597_v18  ;;  %v1628_v18 = vld [vmem:[%s2117_s10 + $0x30] sm:$0xff]  }
 0x2cd   :  { %1487 = vmatprep.subr.bf16.mxu1 %v1654_v1 }
 0x382   :  { %v480_v10 = vpop.f32.mrb[4].mxu1 }
 0x383   :  { %v481_v11 = vadd.f32 %v1194_v9, %v480_v10  ;;  %v1425_v12 = vpop.f32.mrb[5].mxu1  ;;  %v1627_v9 = vld [vmem:[%s2117_s10 + $0x28] sm:$0xff]   ;;  %v1230_v10 = vld [vmem:[%s2118_s11 + $0x7] ss:$0 sm:$0xff] }
 0x384   :  { %v483_v13 = vpop.f32.mrb[6].mxu1 }
 0x385   :  { %v486_v14 = vmax.f32 %v481_v11, 0.0  ;;  %v1426_v15 = vpop.f32.mrb[7].mxu1 }
 0x387   :  { %v487_v16 = vpack.c.bf16 %v486_v14, %v486_v14 }
 0x389   :  { %1444 = vmatmul.mubr.bf16.vlgmr.msra.gmra.mrb[8].mxu0 %v487_v16 }
 0x38a   :  { %1483 = vmatprep.mubr.msk.bf16.mxu0 %vm1655_vm0, %v1654_v1  ;;  %1468 = vmatpush3.bf16.msra.mxu0 %v1598_v19  ;;  %v1629_v19 = vld [vmem:[%s2117_s10 + $0x38] sm:$0xff]   ;;  %s1630_s10 = scalar_lea.vmem %s1160_s18, 128 }
 0x38b   :  { %1469 = vmatprep.subr.bf16.mxu0 %v1654_v1  ;;  %p1631_p0 = scmp.ne.s32.totalorder %s1160_s18, %s1630_s10  ;;  %p1636_p2 = scmp.lt.s32.totalorder %s1630_s10, %s1630_s10 }
 0x38d   :  { %p1637_p3 = por %p1636_p2, %p1635_p1 }
 0x38e   :  { %1470 = vmatpush3.bf16.msra.mxu0 %v1599_v20  ;;  %v1239_v20 = vld [vmem:[%s2118_s11 + $0x8] ss:$0 sm:$0xff] }
 0x38f   :  { %1471 = vmatprep.subr.bf16.mxu0 %v1654_v1  ;;  %p1638_p4 = pnand %p1637_p3, %p1631_p0 }
 0x392   :  { %1472 = vmatpush3.bf16.msra.mxu0 %v1600_v21 }
 0x393   :  { %1473 = vmatprep.subr.bf16.mxu0 %v1654_v1 }
 0x396   :  { %1474 = vmatpush3.bf16.msra.mxu0 %v1601_v22 }
 0x397   :  { %1475 = vmatprep.subr.bf16.mxu0 %v1654_v1 }
 0x39a   :  { %1476 = vmatpush3.bf16.msra.mxu0 %v1602_v23 }
 0x39b   :  { %1477 = vmatprep.subr.bf16.mxu0 %v1654_v1 }
 0x39e   :  { %1478 = vmatpush3.bf16.msra.mxu0 %v1603_v24 }
 0x39f   :  { %1479 = vmatprep.subr.bf16.mxu0 %v1654_v1 }
 0x3a2   :  { %1480 = vmatpush3.bf16.msra.mxu0 %v1604_v33 }
 0x3a3   :  { %1481 = vmatprep.subr.bf16.mxu0 %v1654_v1 }
 0x3a6   :  { %1482 = vmatpush3.bf16.msra.mxu0 %v1605_v34 }
 0x3a7   :  { %1507 = vmatprep.subr.bf16.mxu0 %v1654_v1 }
 0x45c   :  { %v591_v26 = vpop.f32.mrb[8].mxu0 }
 0x45d   :  { %v592_v27 = vadd.f32 %v1203_v25, %v591_v26  ;;  %v1445_v28 = vpop.f32.mrb[9].mxu0 }
 0x45e   :  { %v594_v29 = vpop.f32.mrb[10].mxu0 }
 0x45f   :  { %v597_v30 = vmax.f32 %v592_v27, 0.0  ;;  %v1446_v31 = vpop.f32.mrb[11].mxu0 }
 0x461   :  { %v598_v32 = vpack.c.bf16 %v597_v30, %v597_v30 }
 0x463   :  { %1464 = vmatmul.mubr.bf16.vlgmr.msra.gmra.mrb[8].mxu1 %v598_v32 }
 0x464   :  { %1503 = vmatprep.mubr.msk.bf16.mxu1 %vm1655_vm0, %v1654_v1  ;;  %1488 = vmatpush3.bf16.msra.mxu1 %v1606_v35 }
 0x465   :  { %1489 = vmatprep.subr.bf16.mxu1 %v1654_v1 }
 0x468   :  { %1490 = vmatpush3.bf16.msra.mxu1 %v1607_v36 }
 0x469   :  { %1491 = vmatprep.subr.bf16.mxu1 %v1654_v1 }
 0x46c   :  { %1492 = vmatpush3.bf16.msra.mxu1 %v1608_v37 }
 0x46d   :  { %1493 = vmatprep.subr.bf16.mxu1 %v1654_v1 }
 0x470   :  { %1494 = vmatpush3.bf16.msra.mxu1 %v1609_v38 }
 0x471   :  { %1495 = vmatprep.subr.bf16.mxu1 %v1654_v1 }
 0x474   :  { %1496 = vmatpush3.bf16.msra.mxu1 %v1610_v39 }
 0x475   :  { %1497 = vmatprep.subr.bf16.mxu1 %v1654_v1 }
 0x478   :  { %1498 = vmatpush3.bf16.msra.mxu1 %v1611_v40 }
 0x479   :  { %1499 = vmatprep.subr.bf16.mxu1 %v1654_v1 }
 0x47c   :  { %1500 = vmatpush3.bf16.msra.mxu1 %v1612_v49 }
 0x47d   :  { %1501 = vmatprep.subr.bf16.mxu1 %v1654_v1 }
 0x480   :  { %1502 = vmatpush3.bf16.msra.mxu1 %v1613_v50 }
 0x481   :  { %1527 = vmatprep.subr.bf16.mxu1 %v1654_v1 }
 0x536   :  { %v702_v42 = vpop.f32.mrb[8].mxu1 }
 0x537   :  { %v703_v43 = vadd.f32 %v1212_v41, %v702_v42  ;;  %v1465_v44 = vpop.f32.mrb[9].mxu1 }
 0x538   :  { %v705_v45 = vpop.f32.mrb[10].mxu1 }
 0x539   :  { %v708_v46 = vmax.f32 %v703_v43, 0.0  ;;  %v1466_v47 = vpop.f32.mrb[11].mxu1 }
 0x53b   :  { %v709_v48 = vpack.c.bf16 %v708_v46, %v708_v46 }
 0x53d   :  { %1484 = vmatmul.mubr.bf16.vlgmr.msra.gmra.mrb[12].mxu0 %v709_v48 }
 0x53e   :  { %1523 = vmatprep.mubr.msk.bf16.mxu0 %vm1655_vm0, %v1654_v1  ;;  %1508 = vmatpush3.bf16.msra.mxu0 %v1614_v51 }
 0x53f   :  { %1509 = vmatprep.subr.bf16.mxu0 %v1654_v1 }
 0x542   :  { %1510 = vmatpush3.bf16.msra.mxu0 %v1615_v52 }
 0x543   :  { %1511 = vmatprep.subr.bf16.mxu0 %v1654_v1 }
 0x546   :  { %1512 = vmatpush3.bf16.msra.mxu0 %v1616_v53 }
 0x547   :  { %1513 = vmatprep.subr.bf16.mxu0 %v1654_v1 }
 0x54a   :  { %1514 = vmatpush3.bf16.msra.mxu0 %v1617_v54 }
 0x54b   :  { %1515 = vmatprep.subr.bf16.mxu0 %v1654_v1 }
 0x54e   :  { %1516 = vmatpush3.bf16.msra.mxu0 %v1618_v55 }
 0x54f   :  { %1517 = vmatprep.subr.bf16.mxu0 %v1654_v1 }
 0x552   :  { %1518 = vmatpush3.bf16.msra.mxu0 %v1619_v56 }
 0x553   :  { %1519 = vmatprep.subr.bf16.mxu0 %v1654_v1 }
 0x556   :  { %1520 = vmatpush3.bf16.msra.mxu0 %v1620_v2 }
 0x557   :  { %1521 = vmatprep.subr.bf16.mxu0 %v1654_v1 }
 0x55a   :  { %1522 = vmatpush3.bf16.msra.mxu0 %v1621_v3 }
 0x610   :  { %v813_v58 = vpop.f32.mrb[12].mxu0 }
 0x611   :  { %v814_v59 = vadd.f32 %v1221_v57, %v813_v58  ;;  %v1485_v60 = vpop.f32.mrb[13].mxu0 }
 0x612   :  { %v816_v61 = vpop.f32.mrb[14].mxu0 }
 0x613   :  { %v819_v62 = vmax.f32 %v814_v59, 0.0  ;;  %v1486_v63 = vpop.f32.mrb[15].mxu0 }
 0x615   :  { %v820_v0 = vpack.c.bf16 %v819_v62, %v819_v62 }
 0x617   :  { %1504 = vmatmul.mubr.bf16.vlgmr.msra.gmra.mrb[12].mxu1 %v820_v0 }
 0x618   :  { %1543 = vmatprep.mubr.msk.bf16.mxu1 %vm1655_vm0, %v1654_v1  ;;  %1528 = vmatpush3.bf16.msra.mxu1 %v1622_v4 }
 0x619   :  { %1529 = vmatprep.subr.bf16.mxu1 %v1654_v1 }
 0x61c   :  { %1530 = vmatpush3.bf16.msra.mxu1 %v1623_v5 }
 0x61d   :  { %1531 = vmatprep.subr.bf16.mxu1 %v1654_v1 }
 0x620   :  { %1532 = vmatpush3.bf16.msra.mxu1 %v1624_v6 }
 0x621   :  { %1533 = vmatprep.subr.bf16.mxu1 %v1654_v1 }
 0x624   :  { %1534 = vmatpush3.bf16.msra.mxu1 %v1625_v7 }
 0x625   :  { %1535 = vmatprep.subr.bf16.mxu1 %v1654_v1 }
 0x628   :  { %1536 = vmatpush3.bf16.msra.mxu1 %v1626_v8 }
 0x629   :  { %1537 = vmatprep.subr.bf16.mxu1 %v1654_v1 }
 0x62c   :  { %1538 = vmatpush3.bf16.msra.mxu1 %v1627_v9 }
 0x62d   :  { %1539 = vmatprep.subr.bf16.mxu1 %v1654_v1 }
 0x630   :  { %1540 = vmatpush3.bf16.msra.mxu1 %v1628_v18 }
 0x631   :  { %1541 = vmatprep.subr.bf16.mxu1 %v1654_v1  ;;  %v1248_v1 = vld [vmem:[%s2118_s11 + $0x9] ss:$0 sm:$0xff] }
 0x634   :  { %1542 = vmatpush3.bf16.msra.mxu1 %v1629_v19 }
 0x6ea   :  { %v924_v11 = vpop.f32.mrb[12].mxu1 }
 0x6eb   :  { %v925_v12 = vadd.f32 %v1230_v10, %v924_v11  ;;  %v1505_v13 = vpop.f32.mrb[13].mxu1 }
 0x6ec   :  { %v927_v14 = vpop.f32.mrb[14].mxu1 }
 0x6ed   :  { %v930_v15 = vmax.f32 %v925_v12, 0.0  ;;  %v1506_v16 = vpop.f32.mrb[15].mxu1 }
 0x6ef   :  { %v931_v17 = vpack.c.bf16 %v930_v15, %v930_v15 }
 0x6f1   :  { %1524 = vmatmul.mubr.bf16.vlgmr.msra.gmra.mrb[16].mxu0 %v931_v17 }
 0x7c4   :  { %v1035_v21 = vpop.f32.mrb[16].mxu0 }
 0x7c5   :  { %v1036_v22 = vadd.f32 %v1239_v20, %v1035_v21  ;;  %v1525_v23 = vpop.f32.mrb[17].mxu0 }
 0x7c6   :  { %v1038_v24 = vpop.f32.mrb[18].mxu0 }
 0x7c7   :  { %v1041_v25 = vmax.f32 %v1036_v22, 0.0  ;;  %v1526_v26 = vpop.f32.mrb[19].mxu0 }
 0x7c9   :  { %v1042_v27 = vpack.c.bf16 %v1041_v25, %v1041_v25 }
 0x7cb   :  { %1544 = vmatmul.mubr.bf16.vlgmr.msra.gmra.mrb[16].mxu1 %v1042_v27 }
 0x89e   :  { %v1146_v28 = vpop.f32.mrb[16].mxu1 }
 0x89f   :  { %v1147_v29 = vadd.f32 %v1248_v1, %v1146_v28  ;;  %v1545_v30 = vpop.f32.mrb[17].mxu1 }
 0x8a0   :  { %v1149_v31 = vpop.f32.mrb[18].mxu1 }
 0x8a1   :  { %1152 = vst [vmem:[#allocation2] sm:$0xff] %v1147_v29  ;;  %v1546_v32 = vpop.f32.mrb[19].mxu1 }
 0x8a2   :  { %1641 = shalt.err (!%p1638_p4)
}
 0x8a3   :  { %s1642_s11 = scalar_lea.hbm %s2119_s12, 128 }
 0x8a4   :  { %p1643_p5 = scmp.ne.s32.totalorder %s2119_s12, %s1642_s11  ;;  %p1646_p6 = scmp.lt.u32.totalorder %s1642_s11, %s2119_s12 }
 0x8a6   :  { %p1648_p7 = pnand %p1646_p6, %p1643_p5 }
 0x8a8   :  { %1651 = shalt.err (!%p1648_p7)
}
 0x8a9   :  { %1162 = dma.vmem_to_hbm [thread:$0]  %s1160_s18, 128, %s2119_s12, [#allocation3]  }
 0x8aa   :  { %1652 = dma.done.wait [#allocation3], 128  }
 0x8ab   :  { %1653 = vsyncadd [#allocation3], 4294967168 }
 0x8ac   :  { %1166 = vsyncpa [#allocation3], 1 }

</bundles_post_ra>
